<compile_context>
chip_gen: v7x
topology: tpu7x:2x2x1
jax: 0.10.0
libtpu: 0.0.40
codegen_flags: <defaults>
</compile_context>

<pallas_src>
import math

import jax
import jax.numpy as jnp
from jax.experimental import pallas as pl
from jax.experimental.pallas import tpu as pltpu

# ----- cfg (small demo shapes consistent with the module) -----
EMB = 32              # cfg['emb_dim']
HEADS = 4             # cfg['n_heads']
HEAD_DIM = EMB // HEADS
SEQ = 8               # cfg['context_len']
FF_HIDDEN = 4 * EMB   # FeedForward hidden width (lane-dense: 128)
EPS = 1e-5


def _layer_norm(x, gamma, beta):
    mean = jnp.mean(x, axis=-1, keepdims=True)
    var = jnp.mean((x - mean) ** 2, axis=-1, keepdims=True)   # unbiased=False
    return (x - mean) * jax.lax.rsqrt(var + EPS) * gamma + beta


def _gelu_tanh(x):
    c = math.sqrt(2.0 / math.pi)
    return 0.5 * x * (1.0 + jnp.tanh(c * (x + 0.044715 * x * x * x)))


def _transformer_block_kernel(
    x_ref,
    wq_ref, bq_ref, wk_ref, bk_ref, wv_ref, bv_ref, wo_ref, bo_ref,
    g1_ref, s1_ref, g2_ref, s2_ref,
    w1_ref, fb1_ref, w2_ref, fb2_ref,
    o_ref,
):
    """One grid step == one batch element; everything stays in VMEM."""
    x = x_ref[0]                                              # (SEQ, EMB) f32

    # ---- LayerNorm 1 ----
    xn = _layer_norm(x, g1_ref[...], s1_ref[...])

    # ---- Multi-head causal self-attention ----
    q = jnp.dot(xn, wq_ref[...], preferred_element_type=jnp.float32) + bq_ref[...]
    k = jnp.dot(xn, wk_ref[...], preferred_element_type=jnp.float32) + bk_ref[...]
    v = jnp.dot(xn, wv_ref[...], preferred_element_type=jnp.float32) + bv_ref[...]
    wo = wo_ref[...]

    row = jax.lax.broadcasted_iota(jnp.int32, (SEQ, SEQ), 0)
    col = jax.lax.broadcasted_iota(jnp.int32, (SEQ, SEQ), 1)
    causal_neg = jnp.where(col > row, -1e30, 0.0).astype(jnp.float32)
    scale = 1.0 / math.sqrt(HEAD_DIM)

    # Static per-head loop (HEADS=4).  The head-concat + out_proj is folded
    # into a sum of per-head projections, so no in-kernel concatenate or 3-D
    # transpose is ever materialized.
    att = jnp.zeros((SEQ, EMB), dtype=jnp.float32)
    for h in range(HEADS):
        sl = slice(h * HEAD_DIM, (h + 1) * HEAD_DIM)
        qh, kh, vh = q[:, sl], k[:, sl], v[:, sl]             # (SEQ, HEAD_DIM)
        s = jnp.einsum("qd,kd->qk", qh, kh,
                       preferred_element_type=jnp.float32) * scale + causal_neg
        m = jnp.max(s, axis=-1, keepdims=True)
        p = jnp.exp(s - m)
        p = p / jnp.sum(p, axis=-1, keepdims=True)            # softmax in f32
        # TODO(synk): attention-weight dropout omitted (eval / drop_rate=0).
        ctx = jnp.dot(p, vh, preferred_element_type=jnp.float32)
        att = att + jnp.dot(ctx, wo[sl, :],
                            preferred_element_type=jnp.float32)
    att = att + bo_ref[...]

    # ---- residual 1 (drop_resid == identity) ----
    x1 = att + x

    # ---- LayerNorm 2 ----
    xn2 = _layer_norm(x1, g2_ref[...], s2_ref[...])

    # ---- FeedForward: Linear(E -> 4E) -> GELU -> Linear(4E -> E) ----
    h1 = jnp.dot(xn2, w1_ref[...], preferred_element_type=jnp.float32) + fb1_ref[...]
    h1 = _gelu_tanh(h1)
    ff = jnp.dot(h1, w2_ref[...], preferred_element_type=jnp.float32) + fb2_ref[...]

    # ---- residual 2 (drop_resid == identity) ----
    o_ref[0] = (ff + x1).astype(o_ref.dtype)


def transformer_block(x, params):
    """Pallas TPU forward of TransformerBlock. x: (B, SEQ, EMB) f32."""
    B, S, E = x.shape
    (wq, bq, wk, bk, wv, bv, wo, bo, g1, s1, g2, s2, w1, fb1, w2, fb2) = params

    def full_spec(arr):
        nd = arr.ndim
        return pl.BlockSpec(arr.shape, lambda b, _nd=nd: (0,) * _nd)

    in_specs = [pl.BlockSpec((1, S, E), lambda b: (b, 0, 0))] + [
        full_spec(p) for p in params
    ]

    return pl.pallas_call(
        _transformer_block_kernel,
        out_shape=jax.ShapeDtypeStruct((B, S, E), x.dtype),
        grid_spec=pltpu.PrefetchScalarGridSpec(
            num_scalar_prefetch=0,
            grid=(B,),
            in_specs=in_specs,
            out_specs=pl.BlockSpec((1, S, E), lambda b: (b, 0, 0)),
        ),
        compiler_params=pltpu.CompilerParams(
            # Batch axis is independent -> shards across v7x's two TensorCores.
            dimension_semantics=("parallel",),
        ),
    )(x, *params)


def transformer_block_ref(x, params):
    """Pure-JAX reference with identical math (for the self-check)."""
    (wq, bq, wk, bk, wv, bv, wo, bo, g1, s1, g2, s2, w1, fb1, w2, fb2) = params
    B, S, E = x.shape
    hi = jax.lax.Precision.HIGHEST

    shortcut = x
    z = _layer_norm(x, g1, s1)
    q = jnp.dot(z, wq, precision=hi) + bq
    k = jnp.dot(z, wk, precision=hi) + bk
    v = jnp.dot(z, wv, precision=hi) + bv
    q = q.reshape(B, S, HEADS, HEAD_DIM).transpose(0, 2, 1, 3)
    k = k.reshape(B, S, HEADS, HEAD_DIM).transpose(0, 2, 1, 3)
    v = v.reshape(B, S, HEADS, HEAD_DIM).transpose(0, 2, 1, 3)
    s_ = jnp.einsum("bhqd,bhkd->bhqk", q, k, precision=hi) / math.sqrt(HEAD_DIM)
    mask = jnp.triu(jnp.ones((S, S), dtype=bool), k=1)
    s_ = jnp.where(mask, -jnp.inf, s_)
    p = jax.nn.softmax(s_, axis=-1)
    ctx = jnp.einsum("bhqk,bhkd->bhqd", p, v, precision=hi)
    ctx = ctx.transpose(0, 2, 1, 3).reshape(B, S, E)
    att = jnp.dot(ctx, wo, precision=hi) + bo
    x1 = att + shortcut
    z2 = _layer_norm(x1, g2, s2)
    h = _gelu_tanh(jnp.dot(z2, w1, precision=hi) + fb1)
    ff = jnp.dot(h, w2, precision=hi) + fb2
    return ff + x1


if __name__ == "__main__":
    key = jax.random.PRNGKey(0)
    keys = jax.random.split(key, 16)
    B = 2

    x = jax.random.normal(keys[0], (B, SEQ, EMB), dtype=jnp.float32)

    def w(k, shape):
        return 0.1 * jax.random.normal(k, shape, dtype=jnp.float32)

    # qkv_bias=False in cfg -> zero Q/K/V biases (adding zeros keeps semantics).
    wq = w(keys[1], (EMB, EMB)); bq = jnp.zeros((1, EMB), jnp.float32)
    wk = w(keys[2], (EMB, EMB)); bk = jnp.zeros((1, EMB), jnp.float32)
    wv = w(keys[3], (EMB, EMB)); bv = jnp.zeros((1, EMB), jnp.float32)
    wo = w(keys[4], (EMB, EMB)); bo = w(keys[5], (1, EMB))
    g1 = 1.0 + w(keys[6], (1, EMB)); s1 = w(keys[7], (1, EMB))
    g2 = 1.0 + w(keys[8], (1, EMB)); s2 = w(keys[9], (1, EMB))
    w1 = w(keys[10], (EMB, FF_HIDDEN)); fb1 = w(keys[11], (1, FF_HIDDEN))
    w2 = w(keys[12], (FF_HIDDEN, EMB)); fb2 = w(keys[13], (1, EMB))

    params = (wq, bq, wk, bk, wv, bv, wo, bo, g1, s1, g2, s2, w1, fb1, w2, fb2)

    y = transformer_block(x, params)
    jax.block_until_ready(y)

    y_ref = transformer_block_ref(x, params)
    assert y.shape == x.shape and y.dtype == x.dtype
    max_err = float(jnp.max(jnp.abs(y - y_ref)))
    assert bool(jnp.allclose(y, y_ref, atol=5e-3, rtol=5e-3)), max_err
    print("KERNEL_OK")
</pallas_src>

<mosaic_0001>
module attributes {stable_mosaic.version = 11 : i64} {
  func.func @_transformer_block_kernel(%arg0: i32, %arg1: memref<1x8x32xf32, #tpu.memory_space<vmem>>, %arg2: memref<32x32xf32, #tpu.memory_space<vmem>>, %arg3: memref<1x32xf32, #tpu.memory_space<vmem>>, %arg4: memref<32x32xf32, #tpu.memory_space<vmem>>, %arg5: memref<1x32xf32, #tpu.memory_space<vmem>>, %arg6: memref<32x32xf32, #tpu.memory_space<vmem>>, %arg7: memref<1x32xf32, #tpu.memory_space<vmem>>, %arg8: memref<32x32xf32, #tpu.memory_space<vmem>>, %arg9: memref<1x32xf32, #tpu.memory_space<vmem>>, %arg10: memref<1x32xf32, #tpu.memory_space<vmem>>, %arg11: memref<1x32xf32, #tpu.memory_space<vmem>>, %arg12: memref<1x32xf32, #tpu.memory_space<vmem>>, %arg13: memref<1x32xf32, #tpu.memory_space<vmem>>, %arg14: memref<32x128xf32, #tpu.memory_space<vmem>>, %arg15: memref<1x128xf32, #tpu.memory_space<vmem>>, %arg16: memref<128x32xf32, #tpu.memory_space<vmem>>, %arg17: memref<1x32xf32, #tpu.memory_space<vmem>>, %arg18: memref<1x8x32xf32, #tpu.memory_space<vmem>>) attributes {dimension_semantics = [#tpu.dimension_semantics<parallel>], iteration_bounds = array<i64: 2>, scalar_prefetch = 0 : i64, scratch_operands = 0 : i64, tpu.core_type = #tpu.core_type<tc>, window_params = [{transform_indices = @transform_0, window_bounds = array<i64: 1, 8, 32>}, {pipeline_mode = #tpu.pipeline_mode<synchronous>, transform_indices = @transform_1, window_bounds = array<i64: 32, 32>}, {pipeline_mode = #tpu.pipeline_mode<synchronous>, transform_indices = @transform_2, window_bounds = array<i64: 1, 32>}, {pipeline_mode = #tpu.pipeline_mode<synchronous>, transform_indices = @transform_3, window_bounds = array<i64: 32, 32>}, {pipeline_mode = #tpu.pipeline_mode<synchronous>, transform_indices = @transform_4, window_bounds = array<i64: 1, 32>}, {pipeline_mode = #tpu.pipeline_mode<synchronous>, transform_indices = @transform_5, window_bounds = array<i64: 32, 32>}, {pipeline_mode = #tpu.pipeline_mode<synchronous>, transform_indices = @transform_6, window_bounds = array<i64: 1, 32>}, {pipeline_mode = #tpu.pipeline_mode<synchronous>, transform_indices = @transform_7, window_bounds = array<i64: 32, 32>}, {pipeline_mode = #tpu.pipeline_mode<synchronous>, transform_indices = @transform_8, window_bounds = array<i64: 1, 32>}, {pipeline_mode = #tpu.pipeline_mode<synchronous>, transform_indices = @transform_9, window_bounds = array<i64: 1, 32>}, {pipeline_mode = #tpu.pipeline_mode<synchronous>, transform_indices = @transform_10, window_bounds = array<i64: 1, 32>}, {pipeline_mode = #tpu.pipeline_mode<synchronous>, transform_indices = @transform_11, window_bounds = array<i64: 1, 32>}, {pipeline_mode = #tpu.pipeline_mode<synchronous>, transform_indices = @transform_12, window_bounds = array<i64: 1, 32>}, {pipeline_mode = #tpu.pipeline_mode<synchronous>, transform_indices = @transform_13, window_bounds = array<i64: 32, 128>}, {pipeline_mode = #tpu.pipeline_mode<synchronous>, transform_indices = @transform_14, window_bounds = array<i64: 1, 128>}, {pipeline_mode = #tpu.pipeline_mode<synchronous>, transform_indices = @transform_15, window_bounds = array<i64: 128, 32>}, {pipeline_mode = #tpu.pipeline_mode<synchronous>, transform_indices = @transform_16, window_bounds = array<i64: 1, 32>}, {transform_indices = @transform_17, window_bounds = array<i64: 1, 8, 32>}]} {
    %c0 = arith.constant 0 : index
    %c0_0 = arith.constant 0 : index
    %c0_1 = arith.constant 0 : index
    %0 = vector.load %arg1[%c0, %c0_0, %c0_1] : memref<1x8x32xf32, #tpu.memory_space<vmem>>, vector<1x8x32xf32>
    %1 = vector.shape_cast %0 : vector<1x8x32xf32> to vector<8x32xf32>
    %c0_2 = arith.constant 0 : index
    %c0_3 = arith.constant 0 : index
    %2 = vector.load %arg10[%c0_2, %c0_3] : memref<1x32xf32, #tpu.memory_space<vmem>>, vector<1x32xf32>
    %c0_4 = arith.constant 0 : index
    %c0_5 = arith.constant 0 : index
    %3 = vector.load %arg11[%c0_4, %c0_5] : memref<1x32xf32, #tpu.memory_space<vmem>>, vector<1x32xf32>
    %cst = arith.constant dense<0.000000e+00> : vector<8xf32>
    %4 = vector.multi_reduction <add>, %1, %cst [1] : vector<8x32xf32> to vector<8xf32>
    %5 = vector.shape_cast %4 : vector<8xf32> to vector<8x1xf32>
    %cst_6 = arith.constant 3.200000e+01 : f32
    %6 = vector.broadcast %cst_6 : f32 to vector<8x1xf32>
    %7 = arith.divf %5, %6 : vector<8x1xf32>
    %8 = vector.broadcast %7 : vector<8x1xf32> to vector<8x32xf32>
    %9 = arith.subf %1, %8 : vector<8x32xf32>
    %10 = arith.mulf %9, %9 : vector<8x32xf32>
    %cst_7 = arith.constant dense<0.000000e+00> : vector<8xf32>
    %11 = vector.multi_reduction <add>, %10, %cst_7 [1] : vector<8x32xf32> to vector<8xf32>
    %12 = vector.shape_cast %11 : vector<8xf32> to vector<8x1xf32>
    %cst_8 = arith.constant 3.200000e+01 : f32
    %13 = vector.broadcast %cst_8 : f32 to vector<8x1xf32>
    %14 = arith.divf %12, %13 : vector<8x1xf32>
    %15 = vector.broadcast %7 : vector<8x1xf32> to vector<8x32xf32>
    %16 = arith.subf %1, %15 : vector<8x32xf32>
    %cst_9 = arith.constant 9.99999974E-6 : f32
    %17 = vector.broadcast %cst_9 : f32 to vector<8x1xf32>
    %18 = arith.addf %14, %17 : vector<8x1xf32>
    %19 = math.rsqrt %18 : vector<8x1xf32>
    %20 = vector.broadcast %19 : vector<8x1xf32> to vector<8x32xf32>
    %21 = arith.mulf %16, %20 : vector<8x32xf32>
    %22 = vector.broadcast %2 : vector<1x32xf32> to vector<8x32xf32>
    %23 = arith.mulf %21, %22 : vector<8x32xf32>
    %24 = vector.broadcast %3 : vector<1x32xf32> to vector<8x32xf32>
    %25 = arith.addf %23, %24 : vector<8x32xf32>
    %c0_10 = arith.constant 0 : index
    %c0_11 = arith.constant 0 : index
    %26 = vector.load %arg2[%c0_10, %c0_11] : memref<32x32xf32, #tpu.memory_space<vmem>>, vector<32x32xf32>
    %cst_12 = arith.constant dense<0.000000e+00> : vector<8x32xf32>
    %27 = tpu.matmul %25, %26, %cst_12 {dimension_numbers = #tpu.dot_dimension_numbers<[1], [0], [0], [1], [0, 0, 1, 1], [], []>} : vector<8x32xf32>, vector<32x32xf32>, vector<8x32xf32> -> vector<8x32xf32>
    %c0_13 = arith.constant 0 : index
    %c0_14 = arith.constant 0 : index
    %28 = vector.load %arg3[%c0_13, %c0_14] : memref<1x32xf32, #tpu.memory_space<vmem>>, vector<1x32xf32>
    %29 = vector.broadcast %28 : vector<1x32xf32> to vector<8x32xf32>
    %30 = arith.addf %27, %29 : vector<8x32xf32>
    %c0_15 = arith.constant 0 : index
    %c0_16 = arith.constant 0 : index
    %31 = vector.load %arg4[%c0_15, %c0_16] : memref<32x32xf32, #tpu.memory_space<vmem>>, vector<32x32xf32>
    %cst_17 = arith.constant dense<0.000000e+00> : vector<8x32xf32>
    %32 = tpu.matmul %25, %31, %cst_17 {dimension_numbers = #tpu.dot_dimension_numbers<[1], [0], [0], [1], [0, 0, 1, 1], [], []>} : vector<8x32xf32>, vector<32x32xf32>, vector<8x32xf32> -> vector<8x32xf32>
    %c0_18 = arith.constant 0 : index
    %c0_19 = arith.constant 0 : index
    %33 = vector.load %arg5[%c0_18, %c0_19] : memref<1x32xf32, #tpu.memory_space<vmem>>, vector<1x32xf32>
    %34 = vector.broadcast %33 : vector<1x32xf32> to vector<8x32xf32>
    %35 = arith.addf %32, %34 : vector<8x32xf32>
    %c0_20 = arith.constant 0 : index
    %c0_21 = arith.constant 0 : index
    %36 = vector.load %arg6[%c0_20, %c0_21] : memref<32x32xf32, #tpu.memory_space<vmem>>, vector<32x32xf32>
    %cst_22 = arith.constant dense<0.000000e+00> : vector<8x32xf32>
    %37 = tpu.matmul %25, %36, %cst_22 {dimension_numbers = #tpu.dot_dimension_numbers<[1], [0], [0], [1], [0, 0, 1, 1], [], []>} : vector<8x32xf32>, vector<32x32xf32>, vector<8x32xf32> -> vector<8x32xf32>
    %c0_23 = arith.constant 0 : index
    %c0_24 = arith.constant 0 : index
    %38 = vector.load %arg7[%c0_23, %c0_24] : memref<1x32xf32, #tpu.memory_space<vmem>>, vector<1x32xf32>
    %39 = vector.broadcast %38 : vector<1x32xf32> to vector<8x32xf32>
    %40 = arith.addf %37, %39 : vector<8x32xf32>
    %c0_25 = arith.constant 0 : index
    %c0_26 = arith.constant 0 : index
    %41 = vector.load %arg8[%c0_25, %c0_26] : memref<32x32xf32, #tpu.memory_space<vmem>>, vector<32x32xf32>
    %42 = tpu.iota {dimensions = array<i32: 0>} : vector<8x8xi32>
    %43 = tpu.iota {dimensions = array<i32: 1>} : vector<8x8xi32>
    %44 = arith.cmpi sgt, %43, %42 : vector<8x8xi32>
    %cst_27 = arith.constant -1.000000e+30 : f32
    %cst_28 = arith.constant 0.000000e+00 : f32
    %45 = vector.broadcast %cst_27 : f32 to vector<8x8xf32>
    %46 = vector.broadcast %cst_28 : f32 to vector<8x8xf32>
    %47 = arith.select %44, %45, %46 : vector<8x8xi1>, vector<8x8xf32>
    %cst_29 = arith.constant 0.000000e+00 : f32
    %48 = vector.broadcast %cst_29 : f32 to vector<8x32xf32>
    %49 = vector.extract_strided_slice %30 {offsets = [0, 0], sizes = [8, 8], strides = [1, 1]} : vector<8x32xf32> to vector<8x8xf32>
    %50 = vector.extract_strided_slice %35 {offsets = [0, 0], sizes = [8, 8], strides = [1, 1]} : vector<8x32xf32> to vector<8x8xf32>
    %51 = vector.extract_strided_slice %40 {offsets = [0, 0], sizes = [8, 8], strides = [1, 1]} : vector<8x32xf32> to vector<8x8xf32>
    "tpu.trace_start"() <{level = 10 : i32, message = "qd,kd->qk"}> : () -> ()
    %cst_30 = arith.constant dense<0.000000e+00> : vector<8x8xf32>
    %52 = tpu.matmul %49, %50, %cst_30 {dimension_numbers = #tpu.dot_dimension_numbers<[1], [1], [0], [0], [0, 0, 1, 0], [], []>} : vector<8x8xf32>, vector<8x8xf32>, vector<8x8xf32> -> vector<8x8xf32>
    "tpu.trace_stop"() : () -> ()
    %cst_31 = arith.constant 0.353553385 : f32
    %53 = vector.broadcast %cst_31 : f32 to vector<8x8xf32>
    %54 = arith.mulf %52, %53 : vector<8x8xf32>
    %55 = arith.addf %54, %47 : vector<8x8xf32>
    %cst_32 = arith.constant dense<0xFF800000> : vector<8xf32>
    %56 = vector.multi_reduction <maximumf>, %55, %cst_32 [1] : vector<8x8xf32> to vector<8xf32>
    %57 = vector.shape_cast %56 : vector<8xf32> to vector<8x1xf32>
    %58 = vector.broadcast %57 : vector<8x1xf32> to vector<8x8xf32>
    %59 = arith.subf %55, %58 : vector<8x8xf32>
    %60 = math.exp %59 : vector<8x8xf32>
    %cst_33 = arith.constant dense<0.000000e+00> : vector<8xf32>
    %61 = vector.multi_reduction <add>, %60, %cst_33 [1] : vector<8x8xf32> to vector<8xf32>
    %62 = vector.shape_cast %61 : vector<8xf32> to vector<8x1xf32>
    %63 = vector.broadcast %62 : vector<8x1xf32> to vector<8x8xf32>
    %64 = arith.divf %60, %63 : vector<8x8xf32>
    %cst_34 = arith.constant dense<0.000000e+00> : vector<8x8xf32>
    %65 = tpu.matmul %64, %51, %cst_34 {dimension_numbers = #tpu.dot_dimension_numbers<[1], [0], [0], [1], [0, 0, 1, 1], [], []>} : vector<8x8xf32>, vector<8x8xf32>, vector<8x8xf32> -> vector<8x8xf32>
    %66 = vector.extract_strided_slice %41 {offsets = [0, 0], sizes = [8, 32], strides = [1, 1]} : vector<32x32xf32> to vector<8x32xf32>
    %cst_35 = arith.constant dense<0.000000e+00> : vector<8x32xf32>
    %67 = tpu.matmul %65, %66, %cst_35 {dimension_numbers = #tpu.dot_dimension_numbers<[1], [0], [0], [1], [0, 0, 1, 1], [], []>} : vector<8x8xf32>, vector<8x32xf32>, vector<8x32xf32> -> vector<8x32xf32>
    %68 = arith.addf %48, %67 : vector<8x32xf32>
    %69 = vector.extract_strided_slice %30 {offsets = [0, 8], sizes = [8, 8], strides = [1, 1]} : vector<8x32xf32> to vector<8x8xf32>
    %70 = vector.extract_strided_slice %35 {offsets = [0, 8], sizes = [8, 8], strides = [1, 1]} : vector<8x32xf32> to vector<8x8xf32>
    %71 = vector.extract_strided_slice %40 {offsets = [0, 8], sizes = [8, 8], strides = [1, 1]} : vector<8x32xf32> to vector<8x8xf32>
    "tpu.trace_start"() <{level = 10 : i32, message = "qd,kd->qk"}> : () -> ()
    %cst_36 = arith.constant dense<0.000000e+00> : vector<8x8xf32>
    %72 = tpu.matmul %69, %70, %cst_36 {dimension_numbers = #tpu.dot_dimension_numbers<[1], [1], [0], [0], [0, 0, 1, 0], [], []>} : vector<8x8xf32>, vector<8x8xf32>, vector<8x8xf32> -> vector<8x8xf32>
    "tpu.trace_stop"() : () -> ()
    %cst_37 = arith.constant 0.353553385 : f32
    %73 = vector.broadcast %cst_37 : f32 to vector<8x8xf32>
    %74 = arith.mulf %72, %73 : vector<8x8xf32>
    %75 = arith.addf %74, %47 : vector<8x8xf32>
    %cst_38 = arith.constant dense<0xFF800000> : vector<8xf32>
    %76 = vector.multi_reduction <maximumf>, %75, %cst_38 [1] : vector<8x8xf32> to vector<8xf32>
    %77 = vector.shape_cast %76 : vector<8xf32> to vector<8x1xf32>
    %78 = vector.broadcast %77 : vector<8x1xf32> to vector<8x8xf32>
    %79 = arith.subf %75, %78 : vector<8x8xf32>
    %80 = math.exp %79 : vector<8x8xf32>
    %cst_39 = arith.constant dense<0.000000e+00> : vector<8xf32>
    %81 = vector.multi_reduction <add>, %80, %cst_39 [1] : vector<8x8xf32> to vector<8xf32>
    %82 = vector.shape_cast %81 : vector<8xf32> to vector<8x1xf32>
    %83 = vector.broadcast %82 : vector<8x1xf32> to vector<8x8xf32>
    %84 = arith.divf %80, %83 : vector<8x8xf32>
    %cst_40 = arith.constant dense<0.000000e+00> : vector<8x8xf32>
    %85 = tpu.matmul %84, %71, %cst_40 {dimension_numbers = #tpu.dot_dimension_numbers<[1], [0], [0], [1], [0, 0, 1, 1], [], []>} : vector<8x8xf32>, vector<8x8xf32>, vector<8x8xf32> -> vector<8x8xf32>
    %86 = vector.extract_strided_slice %41 {offsets = [8, 0], sizes = [8, 32], strides = [1, 1]} : vector<32x32xf32> to vector<8x32xf32>
    %cst_41 = arith.constant dense<0.000000e+00> : vector<8x32xf32>
    %87 = tpu.matmul %85, %86, %cst_41 {dimension_numbers = #tpu.dot_dimension_numbers<[1], [0], [0], [1], [0, 0, 1, 1], [], []>} : vector<8x8xf32>, vector<8x32xf32>, vector<8x32xf32> -> vector<8x32xf32>
    %88 = arith.addf %68, %87 : vector<8x32xf32>
    %89 = vector.extract_strided_slice %30 {offsets = [0, 16], sizes = [8, 8], strides = [1, 1]} : vector<8x32xf32> to vector<8x8xf32>
    %90 = vector.extract_strided_slice %35 {offsets = [0, 16], sizes = [8, 8], strides = [1, 1]} : vector<8x32xf32> to vector<8x8xf32>
    %91 = vector.extract_strided_slice %40 {offsets = [0, 16], sizes = [8, 8], strides = [1, 1]} : vector<8x32xf32> to vector<8x8xf32>
    "tpu.trace_start"() <{level = 10 : i32, message = "qd,kd->qk"}> : () -> ()
    %cst_42 = arith.constant dense<0.000000e+00> : vector<8x8xf32>
    %92 = tpu.matmul %89, %90, %cst_42 {dimension_numbers = #tpu.dot_dimension_numbers<[1], [1], [0], [0], [0, 0, 1, 0], [], []>} : vector<8x8xf32>, vector<8x8xf32>, vector<8x8xf32> -> vector<8x8xf32>
    "tpu.trace_stop"() : () -> ()
    %cst_43 = arith.constant 0.353553385 : f32
    %93 = vector.broadcast %cst_43 : f32 to vector<8x8xf32>
    %94 = arith.mulf %92, %93 : vector<8x8xf32>
    %95 = arith.addf %94, %47 : vector<8x8xf32>
    %cst_44 = arith.constant dense<0xFF800000> : vector<8xf32>
    %96 = vector.multi_reduction <maximumf>, %95, %cst_44 [1] : vector<8x8xf32> to vector<8xf32>
    %97 = vector.shape_cast %96 : vector<8xf32> to vector<8x1xf32>
    %98 = vector.broadcast %97 : vector<8x1xf32> to vector<8x8xf32>
    %99 = arith.subf %95, %98 : vector<8x8xf32>
    %100 = math.exp %99 : vector<8x8xf32>
    %cst_45 = arith.constant dense<0.000000e+00> : vector<8xf32>
    %101 = vector.multi_reduction <add>, %100, %cst_45 [1] : vector<8x8xf32> to vector<8xf32>
    %102 = vector.shape_cast %101 : vector<8xf32> to vector<8x1xf32>
    %103 = vector.broadcast %102 : vector<8x1xf32> to vector<8x8xf32>
    %104 = arith.divf %100, %103 : vector<8x8xf32>
    %cst_46 = arith.constant dense<0.000000e+00> : vector<8x8xf32>
    %105 = tpu.matmul %104, %91, %cst_46 {dimension_numbers = #tpu.dot_dimension_numbers<[1], [0], [0], [1], [0, 0, 1, 1], [], []>} : vector<8x8xf32>, vector<8x8xf32>, vector<8x8xf32> -> vector<8x8xf32>
    %106 = vector.extract_strided_slice %41 {offsets = [16, 0], sizes = [8, 32], strides = [1, 1]} : vector<32x32xf32> to vector<8x32xf32>
    %cst_47 = arith.constant dense<0.000000e+00> : vector<8x32xf32>
    %107 = tpu.matmul %105, %106, %cst_47 {dimension_numbers = #tpu.dot_dimension_numbers<[1], [0], [0], [1], [0, 0, 1, 1], [], []>} : vector<8x8xf32>, vector<8x32xf32>, vector<8x32xf32> -> vector<8x32xf32>
    %108 = arith.addf %88, %107 : vector<8x32xf32>
    %109 = vector.extract_strided_slice %30 {offsets = [0, 24], sizes = [8, 8], strides = [1, 1]} : vector<8x32xf32> to vector<8x8xf32>
    %110 = vector.extract_strided_slice %35 {offsets = [0, 24], sizes = [8, 8], strides = [1, 1]} : vector<8x32xf32> to vector<8x8xf32>
    %111 = vector.extract_strided_slice %40 {offsets = [0, 24], sizes = [8, 8], strides = [1, 1]} : vector<8x32xf32> to vector<8x8xf32>
    "tpu.trace_start"() <{level = 10 : i32, message = "qd,kd->qk"}> : () -> ()
    %cst_48 = arith.constant dense<0.000000e+00> : vector<8x8xf32>
    %112 = tpu.matmul %109, %110, %cst_48 {dimension_numbers = #tpu.dot_dimension_numbers<[1], [1], [0], [0], [0, 0, 1, 0], [], []>} : vector<8x8xf32>, vector<8x8xf32>, vector<8x8xf32> -> vector<8x8xf32>
    "tpu.trace_stop"() : () -> ()
    %cst_49 = arith.constant 0.353553385 : f32
    %113 = vector.broadcast %cst_49 : f32 to vector<8x8xf32>
    %114 = arith.mulf %112, %113 : vector<8x8xf32>
    %115 = arith.addf %114, %47 : vector<8x8xf32>
    %cst_50 = arith.constant dense<0xFF800000> : vector<8xf32>
    %116 = vector.multi_reduction <maximumf>, %115, %cst_50 [1] : vector<8x8xf32> to vector<8xf32>
    %117 = vector.shape_cast %116 : vector<8xf32> to vector<8x1xf32>
    %118 = vector.broadcast %117 : vector<8x1xf32> to vector<8x8xf32>
    %119 = arith.subf %115, %118 : vector<8x8xf32>
    %120 = math.exp %119 : vector<8x8xf32>
    %cst_51 = arith.constant dense<0.000000e+00> : vector<8xf32>
    %121 = vector.multi_reduction <add>, %120, %cst_51 [1] : vector<8x8xf32> to vector<8xf32>
    %122 = vector.shape_cast %121 : vector<8xf32> to vector<8x1xf32>
    %123 = vector.broadcast %122 : vector<8x1xf32> to vector<8x8xf32>
    %124 = arith.divf %120, %123 : vector<8x8xf32>
    %cst_52 = arith.constant dense<0.000000e+00> : vector<8x8xf32>
    %125 = tpu.matmul %124, %111, %cst_52 {dimension_numbers = #tpu.dot_dimension_numbers<[1], [0], [0], [1], [0, 0, 1, 1], [], []>} : vector<8x8xf32>, vector<8x8xf32>, vector<8x8xf32> -> vector<8x8xf32>
    %126 = vector.extract_strided_slice %41 {offsets = [24, 0], sizes = [8, 32], strides = [1, 1]} : vector<32x32xf32> to vector<8x32xf32>
    %cst_53 = arith.constant dense<0.000000e+00> : vector<8x32xf32>
    %127 = tpu.matmul %125, %126, %cst_53 {dimension_numbers = #tpu.dot_dimension_numbers<[1], [0], [0], [1], [0, 0, 1, 1], [], []>} : vector<8x8xf32>, vector<8x32xf32>, vector<8x32xf32> -> vector<8x32xf32>
    %128 = arith.addf %108, %127 : vector<8x32xf32>
    %c0_54 = arith.constant 0 : index
    %c0_55 = arith.constant 0 : index
    %129 = vector.load %arg9[%c0_54, %c0_55] : memref<1x32xf32, #tpu.memory_space<vmem>>, vector<1x32xf32>
    %130 = vector.broadcast %129 : vector<1x32xf32> to vector<8x32xf32>
    %131 = arith.addf %128, %130 : vector<8x32xf32>
    %132 = arith.addf %131, %1 : vector<8x32xf32>
    %c0_56 = arith.constant 0 : index
    %c0_57 = arith.constant 0 : index
    %133 = vector.load %arg12[%c0_56, %c0_57] : memref<1x32xf32, #tpu.memory_space<vmem>>, vector<1x32xf32>
    %c0_58 = arith.constant 0 : index
    %c0_59 = arith.constant 0 : index
    %134 = vector.load %arg13[%c0_58, %c0_59] : memref<1x32xf32, #tpu.memory_space<vmem>>, vector<1x32xf32>
    %cst_60 = arith.constant dense<0.000000e+00> : vector<8xf32>
    %135 = vector.multi_reduction <add>, %132, %cst_60 [1] : vector<8x32xf32> to vector<8xf32>
    %136 = vector.shape_cast %135 : vector<8xf32> to vector<8x1xf32>
    %cst_61 = arith.constant 3.200000e+01 : f32
    %137 = vector.broadcast %cst_61 : f32 to vector<8x1xf32>
    %138 = arith.divf %136, %137 : vector<8x1xf32>
    %139 = vector.broadcast %138 : vector<8x1xf32> to vector<8x32xf32>
    %140 = arith.subf %132, %139 : vector<8x32xf32>
    %141 = arith.mulf %140, %140 : vector<8x32xf32>
    %cst_62 = arith.constant dense<0.000000e+00> : vector<8xf32>
    %142 = vector.multi_reduction <add>, %141, %cst_62 [1] : vector<8x32xf32> to vector<8xf32>
    %143 = vector.shape_cast %142 : vector<8xf32> to vector<8x1xf32>
    %cst_63 = arith.constant 3.200000e+01 : f32
    %144 = vector.broadcast %cst_63 : f32 to vector<8x1xf32>
    %145 = arith.divf %143, %144 : vector<8x1xf32>
    %146 = vector.broadcast %138 : vector<8x1xf32> to vector<8x32xf32>
    %147 = arith.subf %132, %146 : vector<8x32xf32>
    %cst_64 = arith.constant 9.99999974E-6 : f32
    %148 = vector.broadcast %cst_64 : f32 to vector<8x1xf32>
    %149 = arith.addf %145, %148 : vector<8x1xf32>
    %150 = math.rsqrt %149 : vector<8x1xf32>
    %151 = vector.broadcast %150 : vector<8x1xf32> to vector<8x32xf32>
    %152 = arith.mulf %147, %151 : vector<8x32xf32>
    %153 = vector.broadcast %133 : vector<1x32xf32> to vector<8x32xf32>
    %154 = arith.mulf %152, %153 : vector<8x32xf32>
    %155 = vector.broadcast %134 : vector<1x32xf32> to vector<8x32xf32>
    %156 = arith.addf %154, %155 : vector<8x32xf32>
    %c0_65 = arith.constant 0 : index
    %c0_66 = arith.constant 0 : index
    %157 = vector.load %arg14[%c0_65, %c0_66] : memref<32x128xf32, #tpu.memory_space<vmem>>, vector<32x128xf32>
    %cst_67 = arith.constant dense<0.000000e+00> : vector<8x128xf32>
    %158 = tpu.matmul %156, %157, %cst_67 {dimension_numbers = #tpu.dot_dimension_numbers<[1], [0], [0], [1], [0, 0, 1, 1], [], []>} : vector<8x32xf32>, vector<32x128xf32>, vector<8x128xf32> -> vector<8x128xf32>
    %c0_68 = arith.constant 0 : index
    %c0_69 = arith.constant 0 : index
    %159 = vector.load %arg15[%c0_68, %c0_69] : memref<1x128xf32, #tpu.memory_space<vmem>>, vector<1x128xf32>
    %160 = vector.broadcast %159 : vector<1x128xf32> to vector<8x128xf32>
    %161 = arith.addf %158, %160 : vector<8x128xf32>
    %cst_70 = arith.constant 5.000000e-01 : f32
    %162 = vector.broadcast %cst_70 : f32 to vector<8x128xf32>
    %163 = arith.mulf %162, %161 : vector<8x128xf32>
    %cst_71 = arith.constant 4.471500e-02 : f32
    %164 = vector.broadcast %cst_71 : f32 to vector<8x128xf32>
    %165 = arith.mulf %164, %161 : vector<8x128xf32>
    %166 = arith.mulf %165, %161 : vector<8x128xf32>
    %167 = arith.mulf %166, %161 : vector<8x128xf32>
    %168 = arith.addf %161, %167 : vector<8x128xf32>
    %cst_72 = arith.constant 0.797884583 : f32
    %169 = vector.broadcast %cst_72 : f32 to vector<8x128xf32>
    %170 = arith.mulf %169, %168 : vector<8x128xf32>
    %171 = math.tanh %170 : vector<8x128xf32>
    %cst_73 = arith.constant 1.000000e+00 : f32
    %172 = vector.broadcast %cst_73 : f32 to vector<8x128xf32>
    %173 = arith.addf %172, %171 : vector<8x128xf32>
    %174 = arith.mulf %163, %173 : vector<8x128xf32>
    %c0_74 = arith.constant 0 : index
    %c0_75 = arith.constant 0 : index
    %175 = vector.load %arg16[%c0_74, %c0_75] : memref<128x32xf32, #tpu.memory_space<vmem>>, vector<128x32xf32>
    %cst_76 = arith.constant dense<0.000000e+00> : vector<8x32xf32>
    %176 = tpu.matmul %174, %175, %cst_76 {dimension_numbers = #tpu.dot_dimension_numbers<[1], [0], [0], [1], [0, 0, 1, 1], [], []>} : vector<8x128xf32>, vector<128x32xf32>, vector<8x32xf32> -> vector<8x32xf32>
    %c0_77 = arith.constant 0 : index
    %c0_78 = arith.constant 0 : index
    %177 = vector.load %arg17[%c0_77, %c0_78] : memref<1x32xf32, #tpu.memory_space<vmem>>, vector<1x32xf32>
    %178 = vector.broadcast %177 : vector<1x32xf32> to vector<8x32xf32>
    %179 = arith.addf %176, %178 : vector<8x32xf32>
    %180 = arith.addf %179, %132 : vector<8x32xf32>
    %c0_79 = arith.constant 0 : index
    %c0_80 = arith.constant 0 : index
    %c0_81 = arith.constant 0 : index
    %181 = vector.load %arg18[%c0_79, %c0_80, %c0_81] : memref<1x8x32xf32, #tpu.memory_space<vmem>>, vector<1x8x32xf32>
    %182 = vector.shape_cast %181 : vector<1x8x32xf32> to vector<8x32xf32>
    %183 = vector.shape_cast %180 : vector<8x32xf32> to vector<1x8x32xf32>
    tpu.vector_store %arg18[%c0_79, %c0_80, %c0_81], %183 {strides = array<i32>} : memref<1x8x32xf32, #tpu.memory_space<vmem>>, vector<1x8x32xf32>,
    return
  }
  func.func @transform_0(%arg0: i32) -> (i32, i32, i32) {
    %c0_i32 = arith.constant 0 : i32
    %c0_i32_0 = arith.constant 0 : i32
    %c0_i32_1 = arith.constant 0 : i32
    return %arg0, %c0_i32, %c0_i32_0 : i32, i32, i32
  }
  func.func @transform_1(%arg0: i32) -> (i32, i32) {
    %c0_i32 = arith.constant 0 : i32
    %c0_i32_0 = arith.constant 0 : i32
    %c0_i32_1 = arith.constant 0 : i32
    return %c0_i32, %c0_i32_0 : i32, i32
  }
  func.func @transform_2(%arg0: i32) -> (i32, i32) {
    %c0_i32 = arith.constant 0 : i32
    %c0_i32_0 = arith.constant 0 : i32
    %c0_i32_1 = arith.constant 0 : i32
    return %c0_i32, %c0_i32_0 : i32, i32
  }
  func.func @transform_3(%arg0: i32) -> (i32, i32) {
    %c0_i32 = arith.constant 0 : i32
    %c0_i32_0 = arith.constant 0 : i32
    %c0_i32_1 = arith.constant 0 : i32
    return %c0_i32, %c0_i32_0 : i32, i32
  }
  func.func @transform_4(%arg0: i32) -> (i32, i32) {
    %c0_i32 = arith.constant 0 : i32
    %c0_i32_0 = arith.constant 0 : i32
    %c0_i32_1 = arith.constant 0 : i32
    return %c0_i32, %c0_i32_0 : i32, i32
  }
  func.func @transform_5(%arg0: i32) -> (i32, i32) {
    %c0_i32 = arith.constant 0 : i32
    %c0_i32_0 = arith.constant 0 : i32
    %c0_i32_1 = arith.constant 0 : i32
    return %c0_i32, %c0_i32_0 : i32, i32
  }
  func.func @transform_6(%arg0: i32) -> (i32, i32) {
    %c0_i32 = arith.constant 0 : i32
    %c0_i32_0 = arith.constant 0 : i32
    %c0_i32_1 = arith.constant 0 : i32
    return %c0_i32, %c0_i32_0 : i32, i32
  }
  func.func @transform_7(%arg0: i32) -> (i32, i32) {
    %c0_i32 = arith.constant 0 : i32
    %c0_i32_0 = arith.constant 0 : i32
    %c0_i32_1 = arith.constant 0 : i32
    return %c0_i32, %c0_i32_0 : i32, i32
  }
  func.func @transform_8(%arg0: i32) -> (i32, i32) {
    %c0_i32 = arith.constant 0 : i32
    %c0_i32_0 = arith.constant 0 : i32
    %c0_i32_1 = arith.constant 0 : i32
    return %c0_i32, %c0_i32_0 : i32, i32
  }
  func.func @transform_9(%arg0: i32) -> (i32, i32) {
    %c0_i32 = arith.constant 0 : i32
    %c0_i32_0 = arith.constant 0 : i32
    %c0_i32_1 = arith.constant 0 : i32
    return %c0_i32, %c0_i32_0 : i32, i32
  }
  func.func @transform_10(%arg0: i32) -> (i32, i32) {
    %c0_i32 = arith.constant 0 : i32
    %c0_i32_0 = arith.constant 0 : i32
    %c0_i32_1 = arith.constant 0 : i32
    return %c0_i32, %c0_i32_0 : i32, i32
  }
  func.func @transform_11(%arg0: i32) -> (i32, i32) {
    %c0_i32 = arith.constant 0 : i32
    %c0_i32_0 = arith.constant 0 : i32
    %c0_i32_1 = arith.constant 0 : i32
    return %c0_i32, %c0_i32_0 : i32, i32
  }
  func.func @transform_12(%arg0: i32) -> (i32, i32) {
    %c0_i32 = arith.constant 0 : i32
    %c0_i32_0 = arith.constant 0 : i32
    %c0_i32_1 = arith.constant 0 : i32
    return %c0_i32, %c0_i32_0 : i32, i32
  }
  func.func @transform_13(%arg0: i32) -> (i32, i32) {
    %c0_i32 = arith.constant 0 : i32
    %c0_i32_0 = arith.constant 0 : i32
    %c0_i32_1 = arith.constant 0 : i32
    return %c0_i32, %c0_i32_0 : i32, i32
  }
  func.func @transform_14(%arg0: i32) -> (i32, i32) {
    %c0_i32 = arith.constant 0 : i32
    %c0_i32_0 = arith.constant 0 : i32
    %c0_i32_1 = arith.constant 0 : i32
    return %c0_i32, %c0_i32_0 : i32, i32
  }
  func.func @transform_15(%arg0: i32) -> (i32, i32) {
    %c0_i32 = arith.constant 0 : i32
    %c0_i32_0 = arith.constant 0 : i32
    %c0_i32_1 = arith.constant 0 : i32
    return %c0_i32, %c0_i32_0 : i32, i32
  }
  func.func @transform_16(%arg0: i32) -> (i32, i32) {
    %c0_i32 = arith.constant 0 : i32
    %c0_i32_0 = arith.constant 0 : i32
    %c0_i32_1 = arith.constant 0 : i32
    return %c0_i32, %c0_i32_0 : i32, i32
  }
  func.func @transform_17(%arg0: i32) -> (i32, i32, i32) {
    %c0_i32 = arith.constant 0 : i32
    %c0_i32_0 = arith.constant 0 : i32
    %c0_i32_1 = arith.constant 0 : i32
    return %arg0, %c0_i32, %c0_i32_0 : i32, i32, i32
  }
}

</mosaic_0001>

<bundles_post_ra>
// kernel: tpu_custom_call.1
= control target key start
LH: loop header
LB: loop body
LE: loop exit
PB: predicated region body
PF: predicated region fallthrough
CT: control target
= control target key end

     0   :  { %s3123_s0 = inlined_call_operand.hbm [shape: f32[2,8,32], index: 0, kind: input, shape index: {}]   ;;  %s3124_s1 = inlined_call_operand.vmem [shape: f32[32,32], index: 1, kind: input, shape index: {}]   ;;  %s3125_s2 = inlined_call_operand.vmem [shape: f32[1,32], index: 2, kind: input, shape index: {}]   ;;  %s3126_s3 = inlined_call_operand.vmem [shape: f32[32,32], index: 3, kind: input, shape index: {}]   ;;  %s3127_s4 = inlined_call_operand.vmem [shape: f32[1,32], index: 4, kind: input, shape index: {}]   ;;  %s3128_s5 = inlined_call_operand.vmem [shape: f32[32,32], index: 5, kind: input, shape index: {}]   ;;  %s3129_s6 = inlined_call_operand.vmem [shape: f32[1,32], index: 6, kind: input, shape index: {}]   ;;  %s3130_s7 = inlined_call_operand.vmem [shape: f32[32,32], index: 7, kind: input, shape index: {}]   ;;  %s3131_s8 = inlined_call_operand.vmem [shape: f32[1,32], index: 8, kind: input, shape index: {}]   ;;  %s3132_s9 = inlined_call_operand.vmem [shape: f32[1,32], index: 9, kind: input, shape index: {}]   ;;  %s3133_s10 = inlined_call_operand.vmem [shape: f32[1,32], index: 10, kind: input, shape index: {}]   ;;  %s3134_s11 = inlined_call_operand.vmem [shape: f32[1,32], index: 11, kind: input, shape index: {}]   ;;  %s3135_s12 = inlined_call_operand.vmem [shape: f32[1,32], index: 12, kind: input, shape index: {}]   ;;  %s3136_s13 = inlined_call_operand.vmem [shape: f32[32,128], index: 13, kind: input, shape index: {}]   ;;  %s3137_s14 = inlined_call_operand.vmem [shape: f32[1,128], index: 14, kind: input, shape index: {}]   ;;  %s3138_s15 = inlined_call_operand.vmem [shape: f32[128,32], index: 15, kind: input, shape index: {}]   ;;  %s3139_s16 = inlined_call_operand.vmem [shape: f32[1,32], index: 16, kind: input, shape index: {}]   ;;  %s3140_s17 = inlined_call_operand.hbm [shape: f32[2,8,32], index: 17, kind: output, shape index: {}]  }
   0x1   :  { %3153 = sst [smem:[#allocation13_spill]] %s3123_s0 }
   0x2   :  { %3154 = sst [smem:[#allocation14_spill]] %s3124_s1 }
   0x3   :  { %3155 = sst [smem:[#allocation15_spill]] %s3125_s2 }
   0x4   :  { %3156 = sst [smem:[#allocation16_spill]] %s3126_s3 }
   0x5   :  { %3157 = sst [smem:[#allocation17_spill]] %s3139_s16 }
   0x6   :  { %3158 = sst [smem:[#allocation18_spill]] %s3140_s17 }
   0x7   :  { %22 = vsyncpa [#allocation3], 0 }
   0x8   :  { %24 = vsyncpa [#allocation3 + $0x1], 0 }
   0x9   :  { %25 = vsyncpa [#allocation4], 0 }
   0xa   :  { %27 = vsyncpa [#allocation4 + $0x1], 0  ;;  %s2681_s24 = smov 0   ;;  %s2683_s25 = smov 0  }
   0xb   :  { %s2685_s26 = smov 0   ;;  %s2687_s27 = smov 0  }
   0xc LB: > { %3159 = sst [smem:[#allocation8_spill]] %s2569_s24  ;;  %s2702_s28 = sadd.s32 4294967295, %s2581_s27   ;;  %s2581_s27 = sphi %s2687_s27, %s3185_s27   ;;  %s2577_s26 = sphi %s2685_s26, %s3189_s26   ;;  %s2573_s25 = sphi %s2683_s25, %s3188_s25   ;;  %s2569_s24 = sphi %s2681_s24, %s3187_s24  }
   0xd   : > { %3160 = sst [smem:[#allocation9_spill]] %s2702_s28  ;;  %s2121_s29 = sadd.s32 4294967294, %s2581_s27  }
   0xe   : > { %s2706_s0 = sadd.s32 1, %s2581_s27   ;;  %s40_s30 = sadd.s32 1, %s2577_s26 }
   0xf   : > { %3161 = sst [smem:[#allocation10_spill]] %s2706_s0  ;;  %s37_s18 = ssub.s32 %s2581_s27, %s2706_s0 }
  0x10   : > { %p47_p0 = scmp.ne.s32.totalorder %s2577_s26, %s2573_s25  ;;  %p38_p1 = scmp.eq.s32.totalorder %s37_s18, 0 }
  0x11   : > { %p48_p2 = scmp.eq.s32.totalorder %s2581_s27, 0  ;;  %p53_p3 = scmp.ne.s32.totalorder %s2573_s25, %s2569_s24 }
  0x12   : > { %p54_p4 = scmp.eq.s32.totalorder %s2702_s28, 0  ;;  %p413_p7 = scmp.eq.s32.totalorder %s2702_s28, 1 }
  0x13   : > { %s2718_s19 = scalar_select %p38_p1, %s2577_s26, %s40_s30  }
  0x14   : > { %p2720_p5 = por %p48_p2, %p47_p0  ;;  %p2724_p6 = por %p54_p4, %p53_p3 }
  0x15   : > { %3162 = sst [smem:[#allocation11_spill]] %s2718_s19  ;;  %p419_p8 = scmp.eq.s32.totalorder %s2121_s29, 1 }
  0x16   : > { %p2423_p10 = scmp.lt.s32.totalorder %s2581_s27, 2  ;;  %p2731_p11 = por %p413_p7, %p47_p0 }
  0x17   : > { %p2735_p12 = por %p419_p8, %p53_p3  ;;  %s487_s23 = sand.u32 1, %s2577_s26  }
  0x18   : > { %s3165_s21 = scalar_select %p2731_p11, 1, 0 }
  0x19   : > { %s3167_s22 = scalar_select %p2735_p12, 1, 0 }
  0x1a   : > { %3166 = sst [smem:[#allocation12_spill]] %s3165_s21  ;;  %s2125_s30 = sshll.u32 %s2581_s27, 7 }
  0x1b   : > { %s2124_s18 = sshll.u32 %s487_s23, 3  ;;  %s3168_s24 = sld [smem:[#allocation13_spill]] }
  0x1c   : > { %s491_s29 = scalar_lea.vmem [#allocation2], %s2124_s18  ;;  %p2748_p13 = pnand %p2423_p10, %p2720_p5 }
  0x1d   : > { %s498_s28 = sshll.u32 %s491_s29, 4  ;;  %s488_s0 = scalar_lea.sflag [#allocation3], %s487_s23  ;;  %s2752_s28 = int_to_ptr.vmem [resolvable:$true] %s498_s28 }
  0x1e   : > { %p2487_p3 = pneg %p2748_p13 }
  0x21   : > { %s3169_s17 = smov %s3168_s24  ;;  %s2744_s16 = scalar_lea.hbm %s3168_s24, %s2125_s30 }
  0x22   : > { %s2485_s24 = scalar_lea.hbm %s2744_s16, 128  ;;  %s2490_s30 = scalar_lea.hbm %s3169_s17, 256 }
  0x23   : > { %p2486_p2 = scmp.ne.s32.totalorder %s2744_s16, %s2485_s24  ;;  %p2491_p5 = scmp.lt.u32.totalorder %s2744_s16, %s3169_s17 }
  0x24   : > { %p2492_p8 = scmp.lt.u32.totalorder %s2490_s30, %s2485_s24  ;;  %p2494_p9 = scmp.lt.u32.totalorder %s2485_s24, %s2744_s16 }
  0x25   : > { %p2488_p4 = pnand %p2487_p3, %p2486_p2 }
  0x26   : > { %p2493_p10 = por %p2492_p8, %p2491_p5 }
  0x27   : > { %p2489_p7 = pneg %p2488_p4 }
  0x28   : > { %p2495_p0 = por %p2494_p9, %p2493_p10 }
  0x2a   : > { %p2496_p1 = pnand %p2495_p0, %p2489_p7 }
  0x2c   : > { %2499 = shalt.err (!%p2496_p1)
}
  0x2d   : > { %s2500_s23 = scalar_lea.vmem %s2752_s28, 128  ;;  %s2583_s19 = smov [#allocation2]  }
  0x2e   : > { %p2501_p2 = scmp.ne.s32.totalorder %s2752_s28, %s2500_s23  ;;  %s2505_s1 = sshll.u32 %s2583_s19, 4  ;;  %s2506_s1 = int_to_ptr.vmem [resolvable:$false] %s2505_s1 }
  0x2f   : > { %s2507_s18 = scalar_lea.vmem %s2506_s1, 256  ;;  %p2508_p11 = scmp.lt.s32.totalorder %s2752_s28, %s2506_s1 }
  0x30   : > { %p2503_p4 = pnand %p2501_p2, %p2487_p3  ;;  %p2509_p5 = scmp.lt.s32.totalorder %s2507_s18, %s2500_s23 }
  0x32   : > { %p2504_p12 = pneg %p2503_p4  ;;  %p2510_p8 = por %p2509_p5, %p2508_p11 }
  0x34   : > { %p2511_p9 = pnand %p2510_p8, %p2504_p12 }
  0x36   : > { %2514 = shalt.err (!%p2511_p9)
}
  0x37   : > { %2418 = dma.hbm_to_vmem [thread:$0]  (!%p2748_p13), %s2744_s16, 128, %s2752_s28, %s488_s0  }
  0x38   : > { %p3171_p0 = scmp.lt.s32.totalorder %s2581_s27, 3  ;;  %p3172_p1 = scmp.ge.s32.totalorder %s2581_s27, 1 }
  0x3a   : > { %p504_p3 = pnand %p3172_p1, %p3171_p0 }
  0x3b   : > { %s2786_s24 = sand.u32 (!%p504_p3), 1, %s2573_s25  }
  0x3c   : > { %507 = sbr.rel (%p504_p3) target bundleno = 3745 (0xea1), region = 88  ;;  %s3151_s30 = sshll.u32 (!%p504_p3), %s2786_s24, 3 }
  0x3d   : > { %s510_s29 = scalar_lea.sflag (!%p504_p3), [#allocation3], %s2786_s24  ;;  %s513_s21 = scalar_lea.vmem (!%p504_p3), [#allocation2], %s3151_s30 }
  0x43   : > { %2560 = dma.done.wait (%p2724_p6), %s510_s29, 128  }
  0x44   : > { %2562 = vsyncadd (%p2724_p6), %s510_s29, 4294967168  ;;  %vm567_vm0 = vcmask 261120   ;;  %v2796_v0 = vld [vmem:[%s513_s21] sm:$0xff]  ;;  %s3173_s0 = sld [smem:[#allocation14_spill]]  ;;  %v2584_v10 = vmov 0.0|0.0   ;;  %vm2585_vm1 = vmmov 0   ;;  %v846_v50 = vlaneseq }
  0x45   : > { %v568_v1 = vsel %vm567_vm0, %v2796_v0, 0.0  ;;  %2363 = vmatprep.subr.bf16.mxu0 %v2584_v10  ;;  %v2586_v13 = vmov 0.0   ;;  %v2129_v19 = vld [vmem:[%s3132_s9] ss:$0 sm:$0xff]  ;;  %s3174_s3 = sld [smem:[#allocation16_spill]]  ;;  %v762_v31 = vld [vmem:[%s3128_s5 + $0x8] sm:$0xff] }
  0x46   : > { %569 = vadd.xlane.f32.xlu0 %v568_v1  ;;  %2232 = vmatprep.mubr.msk.f32.mxu0 %vm2585_vm1, %v2586_v13  ;;  %v2130_v23 = vld [vmem:[%s3133_s10] ss:$0 sm:$0xff]  ;;  %v763_v33 = vld [vmem:[%s3128_s5 + $0x10] sm:$0xff]  ;;  %v764_v34 = vld [vmem:[%s3128_s5 + $0x18] sm:$0xff]  ;;  %vm852_vm2 = vcmask 64512   ;;  %s3175_s2 = sld [smem:[#allocation15_spill]] }
  0x47   : > { %2262 = vmatprep.subr.mxu1 %v2586_v13  ;;  %2264 = vmatprep.mubr.msk.f32.mxu1 %vm2585_vm1, %v2586_v13  ;;  %v761_v30 = vld [vmem:[%s3128_s5] sm:$0xff]  ;;  %v2379_v35 = vpack.c.bf16 %v764_v34, %v763_v33  ;;  %s2587_s23 = smov 120   ;;  %v847_v51 = vshrl.u32 %v846_v50, 7  ;;  %v849_v52 = vand.u32 127, %v846_v50  ;;  %s2588_s1 = smov 112  }
  0x48   : > { %v2376_v32 = vpack.c.bf16 %v762_v31, %v761_v30  ;;  %v2133_v38 = vld [vmem:[%s3127_s4] ss:$0 sm:$0xff]  ;;  %s2589_s28 = smov 104   ;;  %s3176_s30 = sld [smem:[#allocation9_spill]] }
  0x49   : > { %v2135_v44 = vld [vmem:[%s3129_s6] ss:$0 sm:$0xff]  ;;  %vm850_vm3 = vcmp.gt.s32.totalorder %v849_v52, %v847_v51  ;;  %s3177_s19 = sld [smem:[#allocation12_spill]]  ;;  %s3178_s29 = sld [smem:[#allocation17_spill]] }
  0x4a   : > { %v596_v7 = vld [vmem:[%s3173_s0] sm:$0xff]  ;;  %v597_v8 = vld [vmem:[%s3173_s0 + $0x8] sm:$0xff]  ;;  %v598_v9 = vld [vmem:[%s3173_s0 + $0x10] sm:$0xff]  ;;  %v2899_v54 = vsel %vm850_vm3, -1e+30, %v2586_v13  ;;  %s3179_s16 = sshll.u32 %s2786_s24, 3 }
  0x4b   : > { %v2364_v11 = vpack.c.bf16 %v597_v8, %v596_v7  ;;  %v599_v12 = vld [vmem:[%s3173_s0 + $0x18] sm:$0xff]  ;;  %v680_v21 = vld [vmem:[%s3174_s3] sm:$0xff]  ;;  %v681_v22 = vld [vmem:[%s3174_s3 + $0x8] sm:$0xff]  ;;  %s2590_s18 = smov [#allocation5]  }
  0x4c   : > { %v2367_v14 = vpack.c.bf16 %v599_v12, %v598_v9  ;;  %v2370_v25 = vpack.c.bf16 %v681_v22, %v680_v21  ;;  %v682_v27 = vld [vmem:[%s3174_s3 + $0x10] sm:$0xff]  ;;  %v683_v28 = vld [vmem:[%s3174_s3 + $0x18] sm:$0xff]  ;;  %v2131_v40 = vld [vmem:[%s3175_s2] ss:$0 sm:$0xff]  ;;  %s3180_s2 = sld [smem:[#allocation18_spill]] }
  0x4d   : > { %2365 = vmatpush3.bf16.msra.mxu0 %v2364_v11  ;;  %v2373_v29 = vpack.c.bf16 %v683_v28, %v682_v27  ;;  %v842_v21 = vld [vmem:[%s3130_s7] sm:$0xff] }
  0x4e   : > { %2366 = vmatprep.subr.bf16.mxu0 %v2584_v10  ;;  %s2160_s21 = sshll.u32 %s3176_s30, 7  ;;  %s2038_s30 = scalar_lea.sflag [#allocation4], %s2786_s24 }
  0x4f   : > { %p3181_p11 = scmp.ne.s32.totalorder %s3177_s19, 0 }
  0x51   : > { %2368 = vmatpush3.bf16.msra.mxu0 %v2367_v14 }
  0x52   : > { %2369 = vmatprep.subr.bf16.mxu0 %v2584_v10  ;;  %s3078_s3 = scalar_lea.hbm %s3180_s2, %s2160_s21 }
  0xd3   : > { %v570_v2 = vpop.xlane.xlu0 %569 }
  0xd4   : > { %v572_v3 = vmul.f32 0.03125, %v570_v2 }
  0xd6   : > { %v573_v4 = vsub.f32 %v2796_v0, %v572_v3 }
  0xd8   : > { %v574_v5 = vmul.f32 %v573_v4, %v573_v4 }
  0xda   : > { %v575_v6 = vsel %vm567_vm0, %v574_v5, 0.0 }
  0xdb   : > { %576 = vadd.xlane.f32.xlu0 %v575_v6 }
 0x168   : > { %v577_v15 = vpop.xlane.xlu0 %576 }
 0x169   : > { %v578_v16 = vmul.f32 0.03125, %v577_v15 }
 0x16b   : > { %v579_v17 = vadd.f32 1e-05, %v578_v16  ;;  %v843_v16 = vld [vmem:[%s3130_s7 + $0x8] sm:$0xff] }
 0x16d   : > { %2463 = vrsqrt.f32 %v579_v17 }
 0x177   : > { %v2464_v18 = vpop.eup %2463 }
 0x178   : > { %v581_v20 = vmul.f32 %v2464_v18, %v573_v4 }
 0x17a   : > { %v588_v24 = vmul.f32 %v2129_v19, %v581_v20 }
 0x17c   : > { %v595_v26 = vadd.f32 %v2130_v23, %v588_v24 }
 0x17e   : > { %2233 = vmatmul.mubr.msk.f32.vlgmr.msra.gmra.mrb[0].mxu0 %vm567_vm0, %v595_v26 }
 0x17f   : > { %2371 = vmatpush3.bf16.msra.mxu0 %v2370_v25  ;;  %2243 = vmatprep.mubr.msk.f32.mxu0 %vm2585_vm1, %v2586_v13 }
 0x180   : > { %2372 = vmatprep.subr.bf16.mxu0 %v2584_v10 }
 0x183   : > { %2374 = vmatpush3.bf16.msra.mxu0 %v2373_v29 }
 0x184   : > { %2375 = vmatprep.subr.bf16.mxu0 %v2584_v10 }
 0x186   : > { %2244 = vmatmul.mubr.msk.f32.vlgmr.msra.gmra.mrb[2].mxu0 %vm567_vm0, %v595_v26 }
 0x187   : > { %2377 = vmatpush3.bf16.msra.mxu0 %v2376_v32  ;;  %2254 = vmatprep.mubr.msk.f32.mxu0 %vm2585_vm1, %v2586_v13 }
 0x188   : > { %2378 = vmatprep.subr.bf16.mxu0 %v2584_v10 }
 0x18b   : > { %2380 = vmatpush3.bf16.msra.mxu0 %v2379_v35 }
 0x18c   : > { %2257 = vmatprep.subr.mxu0 %v2586_v13 }
 0x18e   : > { %2255 = vmatmul.mubr.msk.f32.vlgmr.msra.gmra.mrb[4].mxu0 %vm567_vm0, %v595_v26 }
 0x18f   : > { %2259 = vmatprep.mubr.msk.f32.mxu0 %vm2585_vm1, %v2586_v13 }
 0x251   : > { %v676_v36 = vpop.f32.mrb[0].mxu0 }
 0x252   : > { %v2234_v37 = vpop.f32.mrb[1].mxu0  ;;  %v2877_v43 = vadd.f32 %v2131_v40, %v676_v36 }
 0x259   : > { %v757_v39 = vpop.f32.mrb[2].mxu0 }
 0x25a   : > { %v2871_v41 = vadd.f32 %v2133_v38, %v757_v39  ;;  %v2245_v42 = vpop.f32.mrb[3].mxu0 }
 0x25c   : > { %1017 = vrot.lane.b32.xlu1 %v2871_v41, %s2587_s23  ;;  %2258 = vmatpush3.xpose.msk.msra.mxu0 %vm852_vm2, %v2871_v41 }
 0x25d   : > { %2267 = vmatprep.subr.mxu0 %v2586_v13 }
 0x25f   : > { %2260 = vmatmul.mubr.msk.f32.vlgmr.msra.gmra.mrb[6].mxu0 %vm852_vm2, %v2877_v43 }
 0x260   : > { %1015 = vrot.lane.b32.xlu1 %v2877_v43, %s2587_s23  ;;  %2269 = vmatprep.mubr.msk.f32.mxu0 %vm2585_vm1, %v2586_v13 }
 0x261   : > { %v838_v45 = vpop.f32.mrb[4].mxu0 }
 0x262   : > { %v2889_v46 = vadd.f32 %v2135_v44, %v838_v45  ;;  %v2256_v47 = vpop.f32.mrb[5].mxu0 }
 0x264   : > { %2263 = vmatpush3.msra.mxu1 %v2889_v46 }
 0x265   : > { %2272 = vmatprep.subr.mxu1 %v2586_v13 }
 0x2ce   : > { %v1018_v48 = vpop.permute.xlu1 %1017 }
 0x2cf   : > { %2268 = vmatpush3.xpose.msk.msra.mxu0 %vm852_vm2, %v1018_v48 }
 0x2d0   : > { %2277 = vmatprep.subr.mxu0 %v2586_v13 }
 0x2d2   : > { %v1016_v49 = vpop.permute.xlu1 %1015 }
 0x2d3   : > { %2270 = vmatmul.mubr.msk.f32.vlgmr.msra.gmra.mrb[8].mxu0 %vm852_vm2, %v1016_v49 }
 0x2d4   : > { %2279 = vmatprep.mubr.msk.f32.mxu0 %vm2585_vm1, %v2586_v13  ;;  %2278 = vmatpush3.msra.mxu0 %v843_v16 }
 0x2d5   : > { %2287 = vmatprep.subr.mxu0 %v2586_v13 }
 0x332   : > { %v925_v53 = vpop.f32.mrb[6].mxu0 }
 0x333   : > { %v929_v55 = vmul.f32 0.35355338, %v925_v53  ;;  %v2261_v56 = vpop.f32.mrb[7].mxu0 }
 0x335   : > { %v930_v57 = vadd.f32 %v929_v55, %v2899_v54 }
 0x337   : > { %v931_v58 = vsel %vm852_vm2, %v930_v57, -inf }
 0x338   : > { %932 = vmax.xlane.f32.xlu0 %v931_v58 }
 0x3a6   : > { %v1089_v59 = vpop.f32.mrb[8].mxu0 }
 0x3a7   : > { %v1093_v60 = vmul.f32 0.35355338, %v1089_v59  ;;  %v2271_v61 = vpop.f32.mrb[9].mxu0 }
 0x3a9   : > { %v1094_v62 = vadd.f32 %v1093_v60, %v2899_v54 }
 0x3ab   : > { %v1095_v63 = vsel %vm852_vm2, %v1094_v62, -inf }
 0x3ac   : > { %1096 = vmax.xlane.f32.xlu1 %v1095_v63 }
 0x3bd   : > { %1329 = vrot.lane.b32.xlu1 %v2877_v43, %s2588_s1 }
 0x3c5   : > { %v933_v1 = vpop.xlane.xlu0 %932 }
 0x3c6   : > { %v934_v2 = vsub.f32 %v930_v57, %v933_v1 }
 0x3c8   : > { %v935_v3 = vmul.f32 1.442695, %v934_v2 }
 0x3ca   : > { %2465 = vpow2.f32 %v935_v3 }
 0x3d4   : > { %v2466_v4 = vpop.eup %2465 }
 0x3d5   : > { %v937_v5 = vsel %vm852_vm2, %v2466_v4, 0.0 }
 0x3d6   : > { %938 = vadd.xlane.f32.xlu0 %v937_v5 }
 0x439   : > { %v1097_v6 = vpop.xlane.xlu1 %1096 }
 0x43a   : > { %v1098_v7 = vsub.f32 %v1094_v62, %v1097_v6 }
 0x43c   : > { %v1099_v8 = vmul.f32 1.442695, %v1098_v7 }
 0x43d   : > { %v1330_v27 = vpop.permute.xlu1 %1329 }
 0x43e   : > { %2467 = vpow2.f32 %v1099_v8 }
 0x448   : > { %v2468_v9 = vpop.eup %2467 }
 0x449   : > { %v1101_v11 = vsel %vm852_vm2, %v2468_v9, 0.0 }
 0x44a   : > { %1102 = vadd.xlane.f32.xlu0 %v1101_v11  ;;  %v2153_v11 = vld [vmem:[%s3131_s8] ss:$0 sm:$0xff] }
 0x460   : > { %1107 = vrot.lane.b32.xlu0 %v2889_v46, %s2587_s23 }
 0x463   : > { %v939_v12 = vpop.xlane.xlu0 %938 }
 0x464   : > { %2469 = vrcp.f32 %v939_v12  ;;  %1331 = vrot.lane.b32.xlu0 %v2871_v41, %s2588_s1 }
 0x46e   : > { %v2470_v14 = vpop.eup %2469 }
 0x46f   : > { %v941_v15 = vmul.f32 %v2470_v14, %v2466_v4 }
 0x471   : > { %2265 = vmatmul.mubr.msk.f32.vlgmr.msra.gmra.mrb[0].mxu1 %vm852_vm2, %v941_v15 }
 0x472   : > { %2274 = vmatprep.mubr.msk.f32.mxu1 %vm2585_vm1, %v2586_v13 }
 0x4d7   : > { %v1103_v17 = vpop.xlane.xlu0 %1102 }
 0x4d8   : > { %2471 = vrcp.f32 %v1103_v17 }
 0x4db   : > { %v1108_v18 = vpop.permute.xlu0 %1107 }
 0x4dc   : > { %2273 = vmatpush3.msra.mxu1 %v1108_v18 }
 0x4dd   : > { %2282 = vmatprep.subr.mxu1 %v2586_v13 }
 0x4df   : > { %v1332_v25 = vpop.permute.xlu0 %1331 }
 0x4e2   : > { %v2472_v19 = vpop.eup %2471 }
 0x4e3   : > { %v1105_v20 = vmul.f32 %v2472_v19, %v2468_v9 }
 0x4e5   : > { %2275 = vmatmul.mubr.msk.f32.vlgmr.msra.gmra.mrb[2].mxu1 %vm852_vm2, %v1105_v20 }
 0x4e6   : > { %2283 = vmatpush3.msra.mxu1 %v842_v21  ;;  %2284 = vmatprep.mubr.msk.f32.mxu1 %vm2585_vm1, %v2586_v13 }
 0x4e7   : > { %2292 = vmatprep.subr.mxu1 %v2586_v13 }
 0x544   : > { %v1011_v22 = vpop.f32.mrb[0].mxu1 }
 0x545   : > { %v2266_v23 = vpop.f32.mrb[1].mxu1  ;;  %2285 = vmatmul.mubr.msk.f32.vlgmr.msra.gmra.mrb[4].mxu1 %vm852_vm2, %v1011_v22  ;;  %v1849_v22 = vld [vmem:[%s3136_s13] sm:$0xff] }
 0x546   : > { %2294 = vmatprep.mubr.msk.f32.mxu1 %vm2585_vm1, %v2586_v13 }
 0x5b8   : > { %v1179_v24 = vpop.f32.mrb[2].mxu1 }
 0x5b9   : > { %v2276_v26 = vpop.f32.mrb[3].mxu1  ;;  %2280 = vmatmul.mubr.msk.f32.vlgmr.msra.gmra.mrb[10].mxu0 %vm852_vm2, %v1179_v24  ;;  %v1851_v24 = vld [vmem:[%s3136_s13 + $0x10] sm:$0xff] }
 0x5ba   : > { %2288 = vmatpush3.xpose.msk.msra.mxu0 %vm852_vm2, %v1332_v25  ;;  %2289 = vmatprep.mubr.msk.f32.mxu0 %vm2585_vm1, %v2586_v13  ;;  %v1852_v25 = vld [vmem:[%s3136_s13 + $0x18] sm:$0xff] }
 0x5bb   : > { %2297 = vmatprep.subr.mxu0 %v2586_v13  ;;  %v2385_v26 = vpack.c.bf16 %v1852_v25, %v1851_v24 }
 0x5bd   : > { %2290 = vmatmul.mubr.msk.f32.vlgmr.msra.gmra.mrb[12].mxu0 %vm852_vm2, %v1330_v27  ;;  %v1942_v27 = vld [vmem:[%s3138_s15] sm:$0xff] }
 0x5be   : > { %2299 = vmatprep.mubr.msk.f32.mxu0 %vm2585_vm1, %v2586_v13 }
 0x618   : > { %v1325_v28 = vpop.f32.mrb[4].mxu1 }
 0x619   : > { %v2286_v29 = vpop.f32.mrb[5].mxu1 }
 0x68c   : > { %v1252_v30 = vpop.f32.mrb[10].mxu0 }
 0x68d   : > { %v1326_v31 = vadd.f32 %v1325_v28, %v1252_v30  ;;  %v2281_v32 = vpop.f32.mrb[11].mxu0  ;;  %v1943_v28 = vld [vmem:[%s3138_s15 + $0x8] sm:$0xff] }
 0x68e   : > { %v2388_v29 = vpack.c.bf16 %v1943_v28, %v1942_v27 }
 0x690   : > { %v1403_v33 = vpop.f32.mrb[12].mxu0 }
 0x691   : > { %v1407_v34 = vmul.f32 0.35355338, %v1403_v33  ;;  %v2291_v35 = vpop.f32.mrb[13].mxu0 }
 0x693   : > { %v1408_v36 = vadd.f32 %v1407_v34, %v2899_v54  ;;  %v2154_v34 = vld [vmem:[%s3134_s11] ss:$0 sm:$0xff] }
 0x695   : > { %v1409_v37 = vsel %vm852_vm2, %v1408_v36, -inf }
 0x696   : > { %1410 = vmax.xlane.f32.xlu0 %v1409_v37 }
 0x6ac   : > { %1420 = vrot.lane.b32.xlu0 %v2889_v46, %s2588_s1 }
 0x6b0   : > { %1570 = vrot.lane.b32.xlu0 %v2877_v43, %s2589_s28 }
 0x723   : > { %v1411_v38 = vpop.xlane.xlu0 %1410 }
 0x724   : > { %v1412_v39 = vsub.f32 %v1408_v36, %v1411_v38  ;;  %v2155_v36 = vld [vmem:[%s3135_s12] ss:$0 sm:$0xff] }
 0x726   : > { %v1413_v40 = vmul.f32 1.442695, %v1412_v39  ;;  %v1944_v39 = vld [vmem:[%s3138_s15 + $0x10] sm:$0xff] }
 0x727   : > { %v1421_v42 = vpop.permute.xlu0 %1420 }
 0x728   : > { %2473 = vpow2.f32 %v1413_v40  ;;  %2293 = vmatpush3.msra.mxu1 %v1421_v42  ;;  %v1945_v40 = vld [vmem:[%s3138_s15 + $0x18] sm:$0xff] }
 0x729   : > { %2302 = vmatprep.subr.mxu1 %v2586_v13  ;;  %v2391_v42 = vpack.c.bf16 %v1945_v40, %v1944_v39 }
 0x72b   : > { %v1571_v50 = vpop.permute.xlu0 %1570 }
 0x732   : > { %v2474_v44 = vpop.eup %2473 }
 0x733   : > { %v1415_v45 = vsel %vm852_vm2, %v2474_v44, 0.0 }
 0x734   : > { %1416 = vadd.xlane.f32.xlu1 %v1415_v45  ;;  %v1947_v45 = vld [vmem:[%s3138_s15 + $0x28] sm:$0xff] }
 0x745   : > { %1572 = vrot.lane.b32.xlu1 %v2871_v41, %s2589_s28  ;;  %v844_v41 = vld [vmem:[%s3130_s7 + $0x10] sm:$0xff] }
 0x746   : > { %2298 = vmatpush3.msra.mxu0 %v844_v41  ;;  %v1951_v41 = vld [vmem:[%s3138_s15 + $0x48] sm:$0xff] }
 0x747   : > { %2307 = vmatprep.subr.mxu0 %v2586_v13 }
 0x7c1   : > { %v1417_v47 = vpop.xlane.xlu1 %1416 }
 0x7c2   : > { %2475 = vrcp.f32 %v1417_v47 }
 0x7c5   : > { %v1573_v43 = vpop.permute.xlu1 %1572 }
 0x7cc   : > { %v2476_v48 = vpop.eup %2475 }
 0x7cd   : > { %v1419_v49 = vmul.f32 %v2476_v48, %v2474_v44  ;;  %v1946_v44 = vld [vmem:[%s3138_s15 + $0x20] sm:$0xff]  ;;  %v1948_v48 = vld [vmem:[%s3138_s15 + $0x30] sm:$0xff] }
 0x7ce   : > { %v2394_v47 = vpack.c.bf16 %v1947_v45, %v1946_v44 }
 0x7cf   : > { %2295 = vmatmul.mubr.msk.f32.vlgmr.msra.gmra.mrb[6].mxu1 %vm852_vm2, %v1419_v49  ;;  %v1949_v49 = vld [vmem:[%s3138_s15 + $0x38] sm:$0xff] }
 0x7d0   : > { %2303 = vmatpush3.xpose.msk.msra.mxu1 %vm852_vm2, %v1573_v43  ;;  %2304 = vmatprep.mubr.msk.f32.mxu1 %vm2585_vm1, %v2586_v13  ;;  %v2397_v43 = vpack.c.bf16 %v1949_v49, %v1948_v48 }
 0x7d1   : > { %2312 = vmatprep.subr.mxu1 %v2586_v13 }
 0x7d3   : > { %2305 = vmatmul.mubr.msk.f32.vlgmr.msra.gmra.mrb[8].mxu1 %vm852_vm2, %v1571_v50  ;;  %v1950_v50 = vld [vmem:[%s3138_s15 + $0x40] sm:$0xff] }
 0x7d4   : > { %2314 = vmatprep.mubr.msk.f32.mxu1 %vm2585_vm1, %v2586_v13 }
 0x8a2   : > { %v1492_v51 = vpop.f32.mrb[6].mxu1 }
 0x8a3   : > { %v2296_v52 = vpop.f32.mrb[7].mxu1  ;;  %2300 = vmatmul.mubr.msk.f32.vlgmr.msra.gmra.mrb[14].mxu0 %vm852_vm2, %v1492_v51  ;;  %v2400_v51 = vpack.c.bf16 %v1951_v41, %v1950_v50 }
 0x8a4   : > { %2309 = vmatprep.mubr.msk.f32.mxu0 %vm2585_vm1, %v2586_v13  ;;  %v1952_v52 = vld [vmem:[%s3138_s15 + $0x50] sm:$0xff] }
 0x8a6   : > { %v1644_v53 = vpop.f32.mrb[8].mxu1 }
 0x8a7   : > { %v1648_v55 = vmul.f32 0.35355338, %v1644_v53  ;;  %v2306_v56 = vpop.f32.mrb[9].mxu1  ;;  %v1953_v53 = vld [vmem:[%s3138_s15 + $0x58] sm:$0xff] }
 0x8a8   : > { %v1954_v56 = vld [vmem:[%s3138_s15 + $0x60] sm:$0xff] }
 0x8a9   : > { %v1649_v57 = vadd.f32 %v1648_v55, %v2899_v54  ;;  %v845_v54 = vld [vmem:[%s3130_s7 + $0x18] sm:$0xff]  ;;  %v2403_v55 = vpack.c.bf16 %v1953_v53, %v1952_v52 }
 0x8aa   : > { %2313 = vmatpush3.msra.mxu1 %v845_v54 }
 0x8ab   : > { %v1650_v58 = vsel %vm852_vm2, %v1649_v57, -inf  ;;  %2387 = vmatprep.subr.bf16.mxu1 %v2584_v10 }
 0x8ac   : > { %1651 = vmax.xlane.f32.xlu0 %v1650_v58 }
 0x8c2   : > { %1661 = vrot.lane.b32.xlu0 %v2889_v46, %s2589_s28  ;;  %s563_s28 = scalar_lea.vmem [#allocation5], %s3179_s16 }
 0x8c3   : > { %s2051_s20 = sshll.u32 %s563_s28, 4  ;;  %s3080_s20 = int_to_ptr.vmem [resolvable:$true] %s2051_s20 }
 0x8c4   : > { %s2515_s1 = scalar_lea.vmem %s3080_s20, 128 }
 0x8c5   : > { %p2516_p6 = scmp.ne.s32.totalorder %s3080_s20, %s2515_s1 }
 0x8c7   : > { %p2517_p12 = pnand %p2516_p6, %p3181_p11 }
 0x8c9   : > { %p2518_p13 = pneg %p2517_p12 }
 0x939   : > { %v1652_v59 = vpop.xlane.xlu0 %1651 }
 0x93a   : > { %v1653_v60 = vsub.f32 %v1649_v57, %v1652_v59  ;;  %v1955_v57 = vld [vmem:[%s3138_s15 + $0x68] sm:$0xff]  ;;  %v1956_v59 = vld [vmem:[%s3138_s15 + $0x70] sm:$0xff] }
 0x93b   : > { %v2406_v58 = vpack.c.bf16 %v1955_v57, %v1954_v56 }
 0x93c   : > { %v1654_v61 = vmul.f32 1.442695, %v1653_v60  ;;  %v1957_v60 = vld [vmem:[%s3138_s15 + $0x78] sm:$0xff] }
 0x93d   : > { %v1662_v62 = vpop.permute.xlu0 %1661 }
 0x93e   : > { %2477 = vpow2.f32 %v1654_v61  ;;  %2308 = vmatpush3.msra.mxu0 %v1662_v62  ;;  %v2409_v61 = vpack.c.bf16 %v1957_v60, %v1956_v59  ;;  %v2156_v62 = vld [vmem:[%s3137_s14] ss:$0 sm:$0xff] }
 0x93f   : > { %2381 = vmatprep.subr.bf16.mxu0 %v2584_v10 }
 0x948   : > { %v2478_v63 = vpop.eup %2477 }
 0x949   : > { %v1656_v1 = vsel %vm852_vm2, %v2478_v63, 0.0 }
 0x94a   : > { %1657 = vadd.xlane.f32.xlu1 %v1656_v1 }
 0x976   : > { %v1565_v46 = vpop.f32.mrb[14].mxu0 }
 0x977   : > { %v1569_v2 = vadd.f32 %v1565_v46, %v1326_v31  ;;  %v2301_v3 = vpop.f32.mrb[15].mxu0 }
 0x9d7   : > { %v1658_v4 = vpop.xlane.xlu1 %1657 }
 0x9d8   : > { %2479 = vrcp.f32 %v1658_v4 }
 0x9e2   : > { %v2480_v5 = vpop.eup %2479 }
 0x9e3   : > { %v1660_v6 = vmul.f32 %v2480_v5, %v2478_v63 }
 0x9e5   : > { %2310 = vmatmul.mubr.msk.f32.vlgmr.msra.gmra.mrb[16].mxu0 %vm852_vm2, %v1660_v6 }
 0x9e6   : > { %2325 = vmatprep.mubr.msk.f32.mxu0 %vm2585_vm1, %v2586_v13 }
 0xab8   : > { %v1733_v7 = vpop.f32.mrb[16].mxu0 }
 0xab9   : > { %v2311_v8 = vpop.f32.mrb[17].mxu0  ;;  %2315 = vmatmul.mubr.msk.f32.vlgmr.msra.gmra.mrb[10].mxu1 %vm852_vm2, %v1733_v7 }
 0xaba   : > { %2360 = vmatprep.mubr.msk.f32.mxu1 %vm2585_vm1, %v2586_v13  ;;  %2389 = vmatpush3.bf16.msra.mxu1 %v2388_v29 }
 0xabb   : > { %2390 = vmatprep.subr.bf16.mxu1 %v2584_v10 }
 0xabe   : > { %2392 = vmatpush3.bf16.msra.mxu1 %v2391_v42 }
 0xabf   : > { %2393 = vmatprep.subr.bf16.mxu1 %v2584_v10 }
 0xac2   : > { %2395 = vmatpush3.bf16.msra.mxu1 %v2394_v47 }
 0xac3   : > { %2396 = vmatprep.subr.bf16.mxu1 %v2584_v10 }
 0xac6   : > { %2398 = vmatpush3.bf16.msra.mxu1 %v2397_v43 }
 0xac7   : > { %2399 = vmatprep.subr.bf16.mxu1 %v2584_v10 }
 0xaca   : > { %2401 = vmatpush3.bf16.msra.mxu1 %v2400_v51 }
 0xacb   : > { %2402 = vmatprep.subr.bf16.mxu1 %v2584_v10 }
 0xace   : > { %2404 = vmatpush3.bf16.msra.mxu1 %v2403_v55 }
 0xacf   : > { %2405 = vmatprep.subr.bf16.mxu1 %v2584_v10 }
 0xad2   : > { %2407 = vmatpush3.bf16.msra.mxu1 %v2406_v58 }
 0xad3   : > { %2408 = vmatprep.subr.bf16.mxu1 %v2584_v10 }
 0xad6   : > { %2410 = vmatpush3.bf16.msra.mxu1 %v2409_v61 }
 0xb8c   : > { %v1806_v9 = vpop.f32.mrb[10].mxu1 }
 0xb8d   : > { %v1810_v12 = vadd.f32 %v1806_v9, %v1569_v2  ;;  %v2316_v14 = vpop.f32.mrb[11].mxu1  ;;  %v2158_v9 = vld [vmem:[%s3178_s29] ss:$0 sm:$0xff]  ;;  %s2519_s29 = sshll.u32 %s2590_s18, 4  ;;  %s2520_s29 = int_to_ptr.vmem [resolvable:$false] %s2519_s29 }
 0xb8e   : > { %s2521_s16 = scalar_lea.vmem %s2520_s29, 256  ;;  %p2522_p7 = scmp.lt.s32.totalorder %s3080_s20, %s2520_s29 }
 0xb8f   : > { %v1818_v15 = vadd.f32 %v2153_v11, %v1810_v12  ;;  %p2523_p10 = scmp.lt.s32.totalorder %s2521_s16, %s2515_s1 }
 0xb91   : > { %v2984_v16 = vadd.f32 %v1818_v15, %v2796_v0  ;;  %v1850_v0 = vld [vmem:[%s3136_s13 + $0x8] sm:$0xff]  ;;  %p2524_p2 = por %p2523_p10, %p2522_p7 }
 0xb92   : > { %v2382_v23 = vpack.c.bf16 %v1850_v0, %v1849_v22 }
 0xb93   : > { %v1822_v17 = vsel %vm567_vm0, %v2984_v16, 0.0  ;;  %p2525_p4 = pnand %p2524_p2, %p2518_p13 }
 0xb94   : > { %1823 = vadd.xlane.f32.xlu1 %v1822_v17  ;;  %2383 = vmatpush3.bf16.msra.mxu0 %v2382_v23 }
 0xb95   : > { %2384 = vmatprep.subr.bf16.mxu0 %v2584_v10 }
 0xb98   : > { %2386 = vmatpush3.bf16.msra.mxu0 %v2385_v26 }
 0xc21   : > { %v1824_v18 = vpop.xlane.xlu1 %1823 }
 0xc22   : > { %v1825_v19 = vmul.f32 0.03125, %v1824_v18 }
 0xc24   : > { %v1826_v20 = vsub.f32 %v2984_v16, %v1825_v19 }
 0xc26   : > { %v1827_v13 = vmul.f32 %v1826_v20, %v1826_v20 }
 0xc28   : > { %v1828_v21 = vsel %vm567_vm0, %v1827_v13, 0.0 }
 0xc29   : > { %1829 = vadd.xlane.f32.xlu1 %v1828_v21 }
 0xcb6   : > { %v1830_v30 = vpop.xlane.xlu1 %1829 }
 0xcb7   : > { %v1831_v31 = vmul.f32 0.03125, %v1830_v30 }
 0xcb9   : > { %v1832_v32 = vadd.f32 1e-05, %v1831_v31 }
 0xcbb   : > { %2481 = vrsqrt.f32 %v1832_v32 }
 0xcc5   : > { %v2482_v33 = vpop.eup %2481 }
 0xcc6   : > { %v1834_v35 = vmul.f32 %v2482_v33, %v1826_v20 }
 0xcc8   : > { %v1841_v37 = vmul.f32 %v2154_v34, %v1834_v35 }
 0xcca   : > { %v1848_v38 = vadd.f32 %v2155_v36, %v1841_v37 }
 0xccc   : > { %2326 = vmatmul.mubr.msk.f32.vlgmr.msra.gmra.mrb[18].mxu0 %vm567_vm0, %v1848_v38 }
 0xd9f   : > { %v1929_v63 = vpop.f32.mrb[18].mxu0 }
 0xda0   : > { %v1930_v1 = vadd.f32 %v2156_v62, %v1929_v63  ;;  %v2327_v54 = vpop.f32.mrb[19].mxu0 }
 0xda2   : > { %v1934_v46 = vmul.f32 0.044715, %v1930_v1  ;;  %v1933_v7 = vmul.f32 0.5, %v1930_v1 }
 0xda4   : > { %v1935_v2 = vmul.f32 %v1934_v46, %v1930_v1 }
 0xda6   : > { %v1936_v3 = vmul.f32 %v1935_v2, %v1930_v1 }
 0xda8   : > { %v1937_v4 = vadd.f32 %v1936_v3, %v1930_v1 }
 0xdaa   : > { %v1938_v5 = vmul.f32 0.7978846, %v1937_v4 }
 0xdac   : > { %2483 = vtanh.f32 %v1938_v5 }
 0xdb6   : > { %v2484_v6 = vpop.eup %2483 }
 0xdb7   : > { %v1940_v10 = vadd.f32 1.0, %v2484_v6 }
 0xdb9   : > { %v1941_v8 = vmul.f32 %v1940_v10, %v1933_v7 }
 0xdbb   : > { %2361 = vmatmul.mubr.f32.vlgmr.msra.gmra.mrb[12].mxu1 %v1941_v8 }
 0xe8e   : > { %v2031_v11 = vpop.f32.mrb[12].mxu1 }
 0xe8f   : > { %v2032_v12 = vadd.f32 %v2158_v9, %v2031_v11  ;;  %v2362_v14 = vpop.f32.mrb[13].mxu1 }
 0xe91   : > { %v2035_v15 = vadd.f32 %v2032_v12, %v2984_v16 }
 0xe93   : > { %2036 = vst.msk [vmem:[%s563_s28] sm:$0xff] %vm567_vm0, %v2035_v15 }
 0xe94   : > { %2528 = shalt.err (!%p2525_p4)
}
 0xe95   : > { %s2529_s24 = scalar_lea.hbm %s3078_s3, 128  ;;  %s2533_s28 = scalar_lea.hbm %s3180_s2, 256 }
 0xe96   : > { %p2530_p5 = scmp.ne.s32.totalorder %s3078_s3, %s2529_s24  ;;  %p2534_p0 = scmp.lt.u32.totalorder %s3078_s3, %s3180_s2 }
 0xe97   : > { %p2535_p1 = scmp.lt.u32.totalorder %s2533_s28, %s2529_s24  ;;  %p2537_p6 = scmp.lt.u32.totalorder %s2529_s24, %s3078_s3 }
 0xe98   : > { %p2531_p8 = pnand %p2530_p5, %p3181_p11 }
 0xe99   : > { %p2536_p3 = por %p2535_p1, %p2534_p0 }
 0xe9a   : > { %p2532_p9 = pneg %p2531_p8 }
 0xe9b   : > { %p2538_p12 = por %p2537_p6, %p2536_p3 }
 0xe9d   : > { %p2539_p13 = pnand %p2538_p12, %p2532_p9 }
 0xe9f   : > { %2542 = shalt.err (!%p2539_p13)
}
 0xea0   : > { %2413 = dma.vmem_to_hbm [thread:$0]  (%p3181_p11), %s3080_s20, 128, %s3078_s3, %s2038_s30  }
 0xea1 PF: > { %s3182_s1 = sld [smem:[#allocation8_spill]]  ;;  %p3183_p7 = scmp.ne.s32.totalorder %s3167_s22, 0 }
 0xea2   : > { %p3184_p10 = scmp.ge.s32.totalorder %s2581_s27, 2 }
 0xea4   : > { %p2420_p2 = pnand %p3184_p10, %p3183_p7 }
 0xea7   : > { %s2063_s29 = sand.u32 1, %s3182_s1  }
 0xea8   : > { %s2064_s16 = scalar_lea.sflag [#allocation4], %s2063_s29 }
 0xea9   : > { %2564 = dma.done.wait (!%p2420_p2), %s2064_s16, 128  }
 0xeaa   : > { %2566 = vsyncadd (!%p2420_p2), %s2064_s16, 4294967168  ;;  %s3185_s27 = sld [smem:[#allocation10_spill]]  ;;  %s3186_s0 = sld [smem:[#allocation11_spill]] }
 0xeab   : > { %s3187_s24 = smov %s2573_s25  ;;  %s3188_s25 = smov %s2577_s26 }
 0xeb0   : > { %p30_p4 = scmp.ge.s32.totalorder %s3185_s27, 4   ;;  %s3189_s26 = smov %s3186_s0 }
 0xeb2   :  { %32 = sbr.rel (!%p30_p4) target bundleno = 12 (0xc), region = 133 }
 0xeb9   :  { %2069 = vsyncpa [#allocation3], 1 }
 0xeba   :  { %2071 = vsyncpa [#allocation3 + $0x1], 1 }
 0xebb   :  { %2072 = vsyncpa [#allocation4], 1 }
 0xebc   :  { %2074 = vsyncpa [#allocation4 + $0x1], 1 }

</bundles_post_ra>
